<compile_context>
chip_gen: v7x
topology: tpu7x:2x2x1
jax: 0.10.0
libtpu: 0.0.40
codegen_flags: <defaults>
</compile_context>

<pallas_src>
import functools

import jax
import jax.numpy as jnp
from jax.experimental import pallas as pl
from jax.experimental.pallas import tpu as pltpu

LANE = 128
SUBLANE = 8
VMEM_BUDGET = 28 * 1024 * 1024    # keep blocks comfortably under v7x's 32 MiB scoped default
VMEM_LIMIT = 32 * 1024 * 1024     # raises v5e's 16 MiB default; no-op on v6e/v7x


def _round_up(n, m):
    return ((n + m - 1) // m) * m


def actor_kernel(s_ref, r_ref, w1s_ref, w1r_ref, b1_ref, w2_ref, b2_ref,
                 w3_ref, b3_ref, out_ref, *, max_action):
    """One batch tile of the Actor forward pass.

    s_ref:   [TB, state_dim]  f32
    r_ref:   [TB, rho_dim]    f32
    w1s_ref: [state_dim, H]   bf16  (rows of l1 weight that hit `state`)
    w1r_ref: [rho_dim,   H]   bf16  (rows of l1 weight that hit `rho`)
    b1_ref:  [1, H]           f32
    w2_ref:  [H, H]           bf16
    b2_ref:  [1, H]           f32
    w3_ref:  [H, n_out_pad]   bf16  (zero-padded columns beyond action_dim)
    b3_ref:  [1, n_out_pad]   f32   (zero-padded)
    out_ref: [TB, n_out_pad]  f32   (real actions live in [:, :action_dim])
    """
    # Layer 1: concat(state, rho) @ W1 as a split sum (no host concat).
    # bf16 MXU inputs, f32 accumulation.
    h1 = jnp.dot(s_ref[...].astype(jnp.bfloat16), w1s_ref[...],
                 preferred_element_type=jnp.float32)
    h1 = h1 + jnp.dot(r_ref[...].astype(jnp.bfloat16), w1r_ref[...],
                      preferred_element_type=jnp.float32)
    h1 = jnp.maximum(h1 + b1_ref[...], 0.0)

    # Layer 2: Linear + ReLU (f32 activations, bf16 matmul inputs).
    h2 = jnp.dot(h1.astype(jnp.bfloat16), w2_ref[...],
                 preferred_element_type=jnp.float32)
    h2 = jnp.maximum(h2 + b2_ref[...], 0.0)

    # Layer 3: Linear + tanh (only n_out_pad lanes wide), scaled by max_action.
    h3 = jnp.dot(h2.astype(jnp.bfloat16), w3_ref[...],
                 preferred_element_type=jnp.float32)
    h3 = h3 + b3_ref[...]
    out_ref[...] = (max_action * jnp.tanh(h3)).astype(out_ref.dtype)


def _vmem_bytes(tb, state_dim, rho_dim, hidden, n_out_pad):
    """Rough VMEM footprint: double-buffered, lane-padded pipelined blocks
    plus resident weights and internal scratch for the intermediates."""
    def lp(c):                       # lane-padded column count in VMEM
        return _round_up(c, LANE)
    pipelined = 2 * 4 * tb * (lp(state_dim) + lp(rho_dim) + lp(n_out_pad))
    weights = (2 * 2 * ((state_dim + rho_dim) * lp(hidden)
                        + hidden * lp(hidden) + hidden * lp(n_out_pad))
               + 2 * 4 * (2 * lp(hidden) + lp(n_out_pad)))
    scratch = tb * lp(hidden) * (4 + 4 + 2 + 2)   # h1/h2 f32 + bf16 casts
    return pipelined + weights + scratch


def actor_forward(state, rho, params, max_action, action_dim, *, block_b=4096):
    """Batch-tiled Pallas call. params come from `prepare_params`."""
    w1s, w1r, b1, w2, b2, w3p, b3p = params
    batch, state_dim = state.shape
    rho_dim = rho.shape[1]
    hidden = w2.shape[0]
    n_out_pad = w3p.shape[1]            # round_up(action_dim, 8)

    # Batch tile: minimize padding (no host-side jnp.pad; the last grid block
    # may be partial and relies on Pallas's masked OOB handling).
    n_tiles = max(1, pl.cdiv(batch, block_b))
    tb = _round_up(pl.cdiv(batch, n_tiles), SUBLANE)
    # Respect the VMEM budget (matters for v7x's 64 MiB physical VMEM).
    while tb > SUBLANE and _vmem_bytes(tb, state_dim, rho_dim, hidden,
                                       n_out_pad) > VMEM_BUDGET:
        tb = max(SUBLANE, _round_up(tb // 2, SUBLANE))

    grid = (pl.cdiv(batch, tb),)
    rows = grid[0] * tb                  # rows actually processed (incl. pad)

    def act_spec(shape):                 # batch-tiled activations / output
        return pl.BlockSpec(shape, lambda i: (i, 0))

    def res_spec(shape):                 # VMEM-resident weights / biases
        return pl.BlockSpec(shape, lambda i: (0, 0))

    flops = 2 * rows * (state_dim * hidden + rho_dim * hidden
                        + hidden * hidden + hidden * n_out_pad)
    bytes_accessed = (
        batch * (state_dim + rho_dim) * 4                    # activations in
        + (w1s.size + w1r.size + w2.size + w3p.size) * 2     # bf16 weights
        + (b1.size + b2.size + b3p.size) * 4                 # f32 biases
        + batch * n_out_pad * 4)                             # output

    out = pl.pallas_call(
        functools.partial(actor_kernel, max_action=float(max_action)),
        out_shape=jax.ShapeDtypeStruct((batch, n_out_pad), jnp.float32),
        grid=grid,
        in_specs=[
            act_spec((tb, state_dim)),          # state
            act_spec((tb, rho_dim)),            # rho
            res_spec((state_dim, hidden)),      # w1 (state rows)
            res_spec((rho_dim, hidden)),        # w1 (rho rows)
            res_spec((1, hidden)),              # b1
            res_spec((hidden, hidden)),         # w2
            res_spec((1, hidden)),              # b2
            res_spec((hidden, n_out_pad)),      # w3 (sublane-padded columns)
            res_spec((1, n_out_pad)),           # b3 (padded)
        ],
        out_specs=act_spec((tb, n_out_pad)),
        compiler_params=pltpu.CompilerParams(
            dimension_semantics=("parallel",),
            vmem_limit_bytes=VMEM_LIMIT),
        cost_estimate=pl.CostEstimate(
            flops=flops,
            transcendentals=rows * n_out_pad,
            bytes_accessed=bytes_accessed),
    )(state, rho, w1s, w1r, b1, w2, b2, w3p, b3p)

    return out[:, :action_dim]


def init_linear(key, fan_in, fan_out):
    """PyTorch nn.Linear default init: U(-1/sqrt(fan_in), 1/sqrt(fan_in)).

    Returns weight pre-transposed as [fan_in, fan_out] and bias as [fan_out].
    """
    k_w, k_b = jax.random.split(key)
    bound = 1.0 / jnp.sqrt(jnp.float32(fan_in))
    w = jax.random.uniform(k_w, (fan_in, fan_out), jnp.float32, -bound, bound)
    b = jax.random.uniform(k_b, (fan_out,), jnp.float32, -bound, bound)
    return w, b


def prepare_params(w1, b1, w2, b2, w3, b3, state_dim, action_dim):
    """Convert f32 [in,out]/[out] params into the kernel layout:
    w1 split into state/rho rows, bf16 weights, [1,out] f32 biases, and a
    layer-3 weight/bias zero-padded to round_up(action_dim, 8) columns."""
    n_out_pad = _round_up(action_dim, SUBLANE)
    w1s = w1[:state_dim].astype(jnp.bfloat16)
    w1r = w1[state_dim:].astype(jnp.bfloat16)
    w2b = w2.astype(jnp.bfloat16)
    w3p = jnp.zeros((w3.shape[0], n_out_pad), jnp.bfloat16)
    w3p = w3p.at[:, :action_dim].set(w3.astype(jnp.bfloat16))
    b3p = jnp.zeros((1, n_out_pad), jnp.float32)
    b3p = b3p.at[:, :action_dim].set(b3.reshape(1, -1))
    return (w1s, w1r,
            b1.reshape(1, -1).astype(jnp.float32),
            w2b,
            b2.reshape(1, -1).astype(jnp.float32),
            w3p, b3p)


if __name__ == "__main__":
    # Small, deterministic example shapes consistent with the module.
    batch = 8
    state_dim = 12
    rho_dim = 4
    action_dim = 6
    hidden = 64          # self.hidden_state = 64 in the module
    max_action = 2.0

    key = jax.random.PRNGKey(0)
    k_state, k_rho, k1, k2, k3 = jax.random.split(key, 5)

    state = jax.random.normal(k_state, (batch, state_dim), jnp.float32)
    rho = jax.random.normal(k_rho, (batch, rho_dim), jnp.float32)

    w1, b1 = init_linear(k1, state_dim + rho_dim, hidden)
    w2, b2 = init_linear(k2, hidden, hidden)
    w3, b3 = init_linear(k3, hidden, action_dim)

    params = prepare_params(w1, b1, w2, b2, w3, b3, state_dim, action_dim)

    out = actor_forward(state, rho, params, max_action, action_dim)
    out = jax.block_until_ready(out)

    # Pure-JAX f32 reference for sanity checking the kernel semantics.
    # Tolerance loosened vs. a pure-f32 kernel because matmul inputs are bf16
    # (expected rounding, not a bug); accumulation is still f32.
    x = jnp.concatenate([state, rho], axis=-1)
    a_ref = jnp.maximum(x @ w1 + b1.reshape(1, -1), 0.0)
    a_ref = jnp.maximum(a_ref @ w2 + b2.reshape(1, -1), 0.0)
    ref = max_action * jnp.tanh(a_ref @ w3 + b3.reshape(1, -1))

    assert out.shape == (batch, action_dim)
    max_err = jnp.max(jnp.abs(out - ref))
    assert jnp.allclose(out, ref, atol=2e-2, rtol=2e-2), f"max abs err {max_err}"
    print("KERNEL_OK")
</pallas_src>

<mosaic_0001>
module attributes {stable_mosaic.version = 11 : i64} {
  func.func @actor_kernel(%arg0: i32, %arg1: memref<8x12xf32, #tpu.memory_space<vmem>>, %arg2: memref<8x4xf32, #tpu.memory_space<vmem>>, %arg3: memref<12x64xbf16, #tpu.memory_space<vmem>>, %arg4: memref<4x64xbf16, #tpu.memory_space<vmem>>, %arg5: memref<1x64xf32, #tpu.memory_space<vmem>>, %arg6: memref<64x64xbf16, #tpu.memory_space<vmem>>, %arg7: memref<1x64xf32, #tpu.memory_space<vmem>>, %arg8: memref<64x8xbf16, #tpu.memory_space<vmem>>, %arg9: memref<1x8xf32, #tpu.memory_space<vmem>>, %arg10: memref<8x8xf32, #tpu.memory_space<vmem>>) attributes {dimension_semantics = [#tpu.dimension_semantics<parallel>], iteration_bounds = array<i64: 1>, scalar_prefetch = 0 : i64, scratch_operands = 0 : i64, tpu.core_type = #tpu.core_type<tc>, window_params = [{transform_indices = @transform_0, window_bounds = array<i64: 8, 12>}, {transform_indices = @transform_1, window_bounds = array<i64: 8, 4>}, {pipeline_mode = #tpu.pipeline_mode<synchronous>, transform_indices = @transform_2, window_bounds = array<i64: 12, 64>}, {pipeline_mode = #tpu.pipeline_mode<synchronous>, transform_indices = @transform_3, window_bounds = array<i64: 4, 64>}, {pipeline_mode = #tpu.pipeline_mode<synchronous>, transform_indices = @transform_4, window_bounds = array<i64: 1, 64>}, {pipeline_mode = #tpu.pipeline_mode<synchronous>, transform_indices = @transform_5, window_bounds = array<i64: 64, 64>}, {pipeline_mode = #tpu.pipeline_mode<synchronous>, transform_indices = @transform_6, window_bounds = array<i64: 1, 64>}, {pipeline_mode = #tpu.pipeline_mode<synchronous>, transform_indices = @transform_7, window_bounds = array<i64: 64, 8>}, {pipeline_mode = #tpu.pipeline_mode<synchronous>, transform_indices = @transform_8, window_bounds = array<i64: 1, 8>}, {transform_indices = @transform_9, window_bounds = array<i64: 8, 8>}]} {
    %c0 = arith.constant 0 : index
    %c0_0 = arith.constant 0 : index
    %0 = vector.load %arg1[%c0, %c0_0] : memref<8x12xf32, #tpu.memory_space<vmem>>, vector<8x12xf32>
    %1 = arith.truncf %0 : vector<8x12xf32> to vector<8x12xbf16>
    %c0_1 = arith.constant 0 : index
    %c0_2 = arith.constant 0 : index
    %2 = vector.load %arg3[%c0_1, %c0_2] : memref<12x64xbf16, #tpu.memory_space<vmem>>, vector<12x64xbf16>
    %cst = arith.constant dense<0.000000e+00> : vector<8x64xf32>
    %3 = tpu.matmul %1, %2, %cst {dimension_numbers = #tpu.dot_dimension_numbers<[1], [0], [0], [1], [0, 0, 1, 1], [], []>} : vector<8x12xbf16>, vector<12x64xbf16>, vector<8x64xf32> -> vector<8x64xf32>
    %c0_3 = arith.constant 0 : index
    %c0_4 = arith.constant 0 : index
    %4 = vector.load %arg2[%c0_3, %c0_4] : memref<8x4xf32, #tpu.memory_space<vmem>>, vector<8x4xf32>
    %5 = arith.truncf %4 : vector<8x4xf32> to vector<8x4xbf16>
    %c0_5 = arith.constant 0 : index
    %c0_6 = arith.constant 0 : index
    %6 = vector.load %arg4[%c0_5, %c0_6] : memref<4x64xbf16, #tpu.memory_space<vmem>>, vector<4x64xbf16>
    %cst_7 = arith.constant dense<0.000000e+00> : vector<8x64xf32>
    %7 = tpu.matmul %5, %6, %cst_7 {dimension_numbers = #tpu.dot_dimension_numbers<[1], [0], [0], [1], [0, 0, 1, 1], [], []>} : vector<8x4xbf16>, vector<4x64xbf16>, vector<8x64xf32> -> vector<8x64xf32>
    %8 = arith.addf %3, %7 : vector<8x64xf32>
    %c0_8 = arith.constant 0 : index
    %c0_9 = arith.constant 0 : index
    %9 = vector.load %arg5[%c0_8, %c0_9] : memref<1x64xf32, #tpu.memory_space<vmem>>, vector<1x64xf32>
    %10 = vector.broadcast %9 : vector<1x64xf32> to vector<8x64xf32>
    %11 = arith.addf %8, %10 : vector<8x64xf32>
    %cst_10 = arith.constant 0.000000e+00 : f32
    %12 = vector.broadcast %cst_10 : f32 to vector<8x64xf32>
    %13 = arith.maximumf %11, %12 : vector<8x64xf32>
    %14 = arith.truncf %13 : vector<8x64xf32> to vector<8x64xbf16>
    %c0_11 = arith.constant 0 : index
    %c0_12 = arith.constant 0 : index
    %15 = vector.load %arg6[%c0_11, %c0_12] : memref<64x64xbf16, #tpu.memory_space<vmem>>, vector<64x64xbf16>
    %cst_13 = arith.constant dense<0.000000e+00> : vector<8x64xf32>
    %16 = tpu.matmul %14, %15, %cst_13 {dimension_numbers = #tpu.dot_dimension_numbers<[1], [0], [0], [1], [0, 0, 1, 1], [], []>} : vector<8x64xbf16>, vector<64x64xbf16>, vector<8x64xf32> -> vector<8x64xf32>
    %c0_14 = arith.constant 0 : index
    %c0_15 = arith.constant 0 : index
    %17 = vector.load %arg7[%c0_14, %c0_15] : memref<1x64xf32, #tpu.memory_space<vmem>>, vector<1x64xf32>
    %18 = vector.broadcast %17 : vector<1x64xf32> to vector<8x64xf32>
    %19 = arith.addf %16, %18 : vector<8x64xf32>
    %cst_16 = arith.constant 0.000000e+00 : f32
    %20 = vector.broadcast %cst_16 : f32 to vector<8x64xf32>
    %21 = arith.maximumf %19, %20 : vector<8x64xf32>
    %22 = arith.truncf %21 : vector<8x64xf32> to vector<8x64xbf16>
    %c0_17 = arith.constant 0 : index
    %c0_18 = arith.constant 0 : index
    %23 = vector.load %arg8[%c0_17, %c0_18] : memref<64x8xbf16, #tpu.memory_space<vmem>>, vector<64x8xbf16>
    %cst_19 = arith.constant dense<0.000000e+00> : vector<8x8xf32>
    %24 = tpu.matmul %22, %23, %cst_19 {dimension_numbers = #tpu.dot_dimension_numbers<[1], [0], [0], [1], [0, 0, 1, 1], [], []>} : vector<8x64xbf16>, vector<64x8xbf16>, vector<8x8xf32> -> vector<8x8xf32>
    %c0_20 = arith.constant 0 : index
    %c0_21 = arith.constant 0 : index
    %25 = vector.load %arg9[%c0_20, %c0_21] : memref<1x8xf32, #tpu.memory_space<vmem>>, vector<1x8xf32>
    %26 = vector.broadcast %25 : vector<1x8xf32> to vector<8x8xf32>
    %27 = arith.addf %24, %26 : vector<8x8xf32>
    %28 = math.tanh %27 : vector<8x8xf32>
    %cst_22 = arith.constant 2.000000e+00 : f32
    %29 = vector.broadcast %cst_22 : f32 to vector<8x8xf32>
    %30 = arith.mulf %29, %28 : vector<8x8xf32>
    %c0_23 = arith.constant 0 : index
    %c0_24 = arith.constant 0 : index
    %31 = vector.load %arg10[%c0_23, %c0_24] : memref<8x8xf32, #tpu.memory_space<vmem>>, vector<8x8xf32>
    tpu.vector_store %arg10[%c0_23, %c0_24], %30 {strides = array<i32>} : memref<8x8xf32, #tpu.memory_space<vmem>>, vector<8x8xf32>,
    return
  }
  func.func @transform_0(%arg0: i32) -> (i32, i32) {
    %c0_i32 = arith.constant 0 : i32
    %c0_i32_0 = arith.constant 0 : i32
    return %arg0, %c0_i32 : i32, i32
  }
  func.func @transform_1(%arg0: i32) -> (i32, i32) {
    %c0_i32 = arith.constant 0 : i32
    %c0_i32_0 = arith.constant 0 : i32
    return %arg0, %c0_i32 : i32, i32
  }
  func.func @transform_2(%arg0: i32) -> (i32, i32) {
    %c0_i32 = arith.constant 0 : i32
    %c0_i32_0 = arith.constant 0 : i32
    %c0_i32_1 = arith.constant 0 : i32
    return %c0_i32, %c0_i32_0 : i32, i32
  }
  func.func @transform_3(%arg0: i32) -> (i32, i32) {
    %c0_i32 = arith.constant 0 : i32
    %c0_i32_0 = arith.constant 0 : i32
    %c0_i32_1 = arith.constant 0 : i32
    return %c0_i32, %c0_i32_0 : i32, i32
  }
  func.func @transform_4(%arg0: i32) -> (i32, i32) {
    %c0_i32 = arith.constant 0 : i32
    %c0_i32_0 = arith.constant 0 : i32
    %c0_i32_1 = arith.constant 0 : i32
    return %c0_i32, %c0_i32_0 : i32, i32
  }
  func.func @transform_5(%arg0: i32) -> (i32, i32) {
    %c0_i32 = arith.constant 0 : i32
    %c0_i32_0 = arith.constant 0 : i32
    %c0_i32_1 = arith.constant 0 : i32
    return %c0_i32, %c0_i32_0 : i32, i32
  }
  func.func @transform_6(%arg0: i32) -> (i32, i32) {
    %c0_i32 = arith.constant 0 : i32
    %c0_i32_0 = arith.constant 0 : i32
    %c0_i32_1 = arith.constant 0 : i32
    return %c0_i32, %c0_i32_0 : i32, i32
  }
  func.func @transform_7(%arg0: i32) -> (i32, i32) {
    %c0_i32 = arith.constant 0 : i32
    %c0_i32_0 = arith.constant 0 : i32
    %c0_i32_1 = arith.constant 0 : i32
    return %c0_i32, %c0_i32_0 : i32, i32
  }
  func.func @transform_8(%arg0: i32) -> (i32, i32) {
    %c0_i32 = arith.constant 0 : i32
    %c0_i32_0 = arith.constant 0 : i32
    %c0_i32_1 = arith.constant 0 : i32
    return %c0_i32, %c0_i32_0 : i32, i32
  }
  func.func @transform_9(%arg0: i32) -> (i32, i32) {
    %c0_i32 = arith.constant 0 : i32
    %c0_i32_0 = arith.constant 0 : i32
    return %arg0, %c0_i32 : i32, i32
  }
}

</mosaic_0001>

<bundles_post_ra>
// kernel: tpu_custom_call.1
= control target key start
LH: loop header
LB: loop body
LE: loop exit
PB: predicated region body
PF: predicated region fallthrough
CT: control target
= control target key end

     0   :  { %vm45_vm0 = vcmask 1041408   ;;  %vm98_vm1 = vcmask 1045504   ;;  %v441_v1 = vmov 0.0   ;;  %vm442_vm2 = vmmov 0   ;;  %s558_s0 = inlined_call_operand.vmem [shape: f32[8,12], index: 0, kind: input, shape index: {}]   ;;  %s559_s1 = inlined_call_operand.vmem [shape: f32[8,4], index: 1, kind: input, shape index: {}]   ;;  %s560_s2 = inlined_call_operand.vmem [shape: bf16[12,64], index: 2, kind: input, shape index: {}]   ;;  %s561_s3 = inlined_call_operand.vmem [shape: bf16[4,64], index: 3, kind: input, shape index: {}]   ;;  %s562_s4 = inlined_call_operand.vmem [shape: f32[1,64], index: 4, kind: input, shape index: {}]   ;;  %s563_s5 = inlined_call_operand.vmem [shape: bf16[64,64], index: 5, kind: input, shape index: {}]   ;;  %s564_s6 = inlined_call_operand.vmem [shape: f32[1,64], index: 6, kind: input, shape index: {}]   ;;  %s565_s7 = inlined_call_operand.vmem [shape: bf16[64,8], index: 7, kind: input, shape index: {}]   ;;  %s566_s8 = inlined_call_operand.vmem [shape: f32[1,8], index: 8, kind: input, shape index: {}]   ;;  %s567_s9 = inlined_call_operand.hbm [shape: f32[8,8], index: 9, kind: output, shape index: {}]  }
   0x1   :  { %v40_v0 = vld [vmem:[%s561_s3] sm:$0x3]  ;;  %367 = vmatprep.subr.bf16.mxu0 %v441_v1  ;;  %373 = vmatprep.subr.bf16.mxu1 %v441_v1  ;;  %vm41_vm3 = vcmask 31744   ;;  %vm94_vm4 = vcmask 97280  }
   0x2   :  { %v47_v2 = vsel %vm45_vm0, %v40_v0, 0  ;;  %v38_v3 = vld [vmem:[%s559_s1] sm:$0xff]  ;;  %369 = vmatprep.mubr.msk.bf16.mxu0 %vm442_vm2, %v441_v1  ;;  %375 = vmatprep.mubr.msk.bf16.mxu1 %vm442_vm2, %v441_v1 }
   0x3   :  { %368 = vmatpush3.bf16.msra.mxu0 %v47_v2  ;;  %v406_v4 = vld [vmem:[%s560_s2] sm:$0x3f]   ;;  %v39_v5 = vpack.c.bf16 %v38_v3, %v38_v3 }
   0x4   :  { %v34_v6 = vld [vmem:[%s558_s0] sm:$0xff]  ;;  %379 = vmatprep.subr.bf16.mxu0 %v441_v1  ;;  %v100_v8 = vsel %vm98_vm1, %v406_v4, 0 }
   0x5   :  { %v407_v7 = vld [vmem:[%s563_s5] sm:$0xff]   ;;  %v35_v9 = vpack.c.bf16 %v34_v6, %v34_v6  ;;  %374 = vmatpush3.bf16.msra.mxu1 %v100_v8 }
   0x6   :  { %370 = vmatmul.mubr.msk.bf16.vlgmr.msra.gmra.mrb[0].mxu0 %vm41_vm3, %v39_v5  ;;  %391 = vmatprep.subr.bf16.mxu1 %v441_v1 }
   0x7   :  { %380 = vmatpush3.bf16.msra.mxu0 %v407_v7  ;;  %387 = vmatprep.mubr.msk.bf16.mxu0 %vm442_vm2, %v441_v1 }
   0x8   :  { %381 = vmatprep.subr.bf16.mxu0 %v441_v1  ;;  %376 = vmatmul.mubr.msk.bf16.vlgmr.msra.gmra.mrb[0].mxu1 %vm94_vm4, %v35_v9 }
   0x9   :  { %14 = vsyncpa [#allocation3], 0  ;;  %399 = vmatprep.mubr.msk.bf16.mxu1 %vm442_vm2, %v441_v1  ;;  %v408_v10 = vld [vmem:[%s563_s5 + $0x8] sm:$0xff]   ;;  %v409_v11 = vld [vmem:[%s563_s5 + $0x10] sm:$0xff]   ;;  %vm191_vm5 = vcmask 523264   ;;  %vm321_vm6 = vcmask 64512  }
   0xa   :  { %v410_v12 = vld [vmem:[%s563_s5 + $0x18] sm:$0xff]   ;;  %v411_v13 = vld [vmem:[%s565_s7] sm:$0xff]   ;;  %v412_v14 = vld [vmem:[%s565_s7 + $0x8] sm:$0xff]  }
   0xb   :  { %382 = vmatpush3.bf16.msra.mxu0 %v408_v10  ;;  %392 = vmatpush3.bf16.msra.mxu1 %v411_v13  ;;  %v340_v19 = vld [vmem:[%s562_s4] ss:$0 sm:$0xff]  ;;  %v413_v28 = vld [vmem:[%s565_s7 + $0x10] sm:$0xff]   ;;  %v414_v29 = vld [vmem:[%s565_s7 + $0x18] sm:$0xff]  }
   0xc   :  { %383 = vmatprep.subr.bf16.mxu0 %v441_v1  ;;  %393 = vmatprep.subr.bf16.mxu1 %v441_v1  ;;  %v341_v30 = vld [vmem:[%s564_s6] ss:$0 sm:$0xff]  ;;  %s443_s6 = smov [#allocation2]  }
   0xd   :  { %v347_v38 = vld [vmem:[%s566_s8] ss:$0 sm:$0xff]  ;;  %s329_s7 = sshll.u32 %s443_s6, 4  ;;  %s330_s7 = int_to_ptr.vmem [resolvable:$true] %s329_s7 }
   0xe   :  { %s417_s12 = scalar_lea.vmem %s330_s7, 128  ;;  %p422_p1 = scmp.lt.s32.totalorder %s330_s7, %s330_s7 }
   0xf   :  { %384 = vmatpush3.bf16.msra.mxu0 %v409_v11  ;;  %394 = vmatpush3.bf16.msra.mxu1 %v412_v14  ;;  %p418_p0 = scmp.ne.s32.totalorder %s330_s7, %s417_s12  ;;  %p423_p2 = scmp.lt.s32.totalorder %s417_s12, %s417_s12 }
  0x10   :  { %385 = vmatprep.subr.bf16.mxu0 %v441_v1  ;;  %395 = vmatprep.subr.bf16.mxu1 %v441_v1 }
  0x11   :  { %p424_p3 = por %p423_p2, %p422_p1 }
  0x13   :  { %386 = vmatpush3.bf16.msra.mxu0 %v410_v12  ;;  %396 = vmatpush3.bf16.msra.mxu1 %v413_v28  ;;  %p425_p4 = pnand %p424_p3, %p418_p0 }
  0x14   :  { %397 = vmatprep.subr.bf16.mxu1 %v441_v1 }
  0x17   :  { %398 = vmatpush3.bf16.msra.mxu1 %v414_v29 }
  0xd9   :  { %v83_v15 = vpop.f32.mrb[0].mxu0 }
  0xda   :  { %v371_v16 = vpop.f32.mrb[1].mxu0 }
  0xdb   :  { %v86_v17 = vpop.f32.mrb[2].mxu0  ;;  %v136_v18 = vpop.f32.mrb[0].mxu1 }
  0xdc   :  { %v372_v20 = vpop.f32.mrb[3].mxu0  ;;  %v137_v21 = vadd.f32 %v136_v18, %v83_v15  ;;  %v377_v22 = vpop.f32.mrb[1].mxu1 }
  0xdd   :  { %v139_v23 = vpop.f32.mrb[2].mxu1 }
  0xde   :  { %v149_v24 = vadd.f32 %v340_v19, %v137_v21  ;;  %v378_v25 = vpop.f32.mrb[3].mxu1 }
  0xe0   :  { %v150_v26 = vmax.f32 %v149_v24, 0.0 }
  0xe2   :  { %v151_v27 = vpack.c.bf16 %v150_v26, %v150_v26 }
  0xe4   :  { %388 = vmatmul.mubr.msk.bf16.vlgmr.msra.gmra.mrb[4].mxu0 %vm191_vm5, %v151_v27 }
 0x1b7   :  { %v229_v31 = vpop.f32.mrb[4].mxu0 }
 0x1b8   :  { %v230_v32 = vadd.f32 %v341_v30, %v229_v31  ;;  %v389_v33 = vpop.f32.mrb[5].mxu0 }
 0x1b9   :  { %v232_v34 = vpop.f32.mrb[6].mxu0 }
 0x1ba   :  { %v235_v35 = vmax.f32 %v230_v32, 0.0  ;;  %v390_v36 = vpop.f32.mrb[7].mxu0 }
 0x1bc   :  { %v236_v37 = vpack.c.bf16 %v235_v35, %v235_v35 }
 0x1be   :  { %400 = vmatmul.mubr.msk.bf16.vlgmr.msra.gmra.mrb[4].mxu1 %vm191_vm5, %v236_v37 }
 0x291   :  { %v313_v39 = vpop.f32.mrb[4].mxu1 }
 0x292   :  { %v314_v40 = vadd.f32 %v347_v38, %v313_v39  ;;  %v401_v41 = vpop.f32.mrb[5].mxu1 }
 0x293   :  { %v316_v42 = vpop.f32.mrb[6].mxu1 }
 0x294   :  { %415 = vtanh.f32 %v314_v40  ;;  %v402_v43 = vpop.f32.mrb[7].mxu1 }
 0x29e   :  { %v416_v44 = vpop.eup %415 }
 0x29f   :  { %v320_v45 = vmul.f32 2.0, %v416_v44 }
 0x2a1   :  { %322 = vst.msk [vmem:[#allocation2] sm:$0xff] %vm321_vm6, %v320_v45 }
 0x2a2   :  { %428 = shalt.err (!%p425_p4)
}
 0x2a3   :  { %s429_s14 = scalar_lea.hbm %s567_s9, 128 }
 0x2a4   :  { %p430_p5 = scmp.ne.s32.totalorder %s567_s9, %s429_s14  ;;  %p433_p6 = scmp.lt.u32.totalorder %s429_s14, %s567_s9 }
 0x2a6   :  { %p435_p7 = pnand %p433_p6, %p430_p5 }
 0x2a8   :  { %438 = shalt.err (!%p435_p7)
}
 0x2a9   :  { %332 = dma.vmem_to_hbm [thread:$0]  %s330_s7, 128, %s567_s9, [#allocation3]  }
 0x2aa   :  { %439 = dma.done.wait [#allocation3], 128  }
 0x2ab   :  { %440 = vsyncadd [#allocation3], 4294967168 }
 0x2ac   :  { %336 = vsyncpa [#allocation3], 1 }

</bundles_post_ra>
